<compile_context>
chip_gen: v7x
topology: tpu7x:2x2x1
jax: 0.10.0
libtpu: 0.0.40
codegen_flags: <defaults>
</compile_context>

<pallas_src>
import functools

import jax
import jax.numpy as jnp
from jax.experimental import pallas as pl
from jax.experimental.pallas import tpu as pltpu


# ---------------------------------------------------------------------------
# Kernel 1: partial fc1 = x @ W1, reduced over K.  One partial per split.
# Grid = (n_split, k_tiles_per_split); axis 1 is the reduction axis.
# ---------------------------------------------------------------------------
def _fc1_partial_kernel(x_ref, w1_ref, part_ref, acc_ref):
    k = pl.program_id(1)

    @pl.when(k == 0)
    def _():
        acc_ref[...] = jnp.zeros_like(acc_ref)

    # bf16 x bf16 -> f32 accumulation on the MXU.
    acc_ref[...] += jnp.dot(x_ref[...], w1_ref[...],
                            preferred_element_type=jnp.float32)

    @pl.when(k == pl.num_programs(1) - 1)
    def _():
        part_ref[...] = acc_ref[...][None, :, :]


# ---------------------------------------------------------------------------
# Kernel 2: reduce partials over the split axis + b1/ReLU/fc2/ReLU/fc3.
# Everything here is tiny (B x 128); a single grid point.
# ---------------------------------------------------------------------------
def _epilogue_kernel(part_ref, b1_ref, w2_ref, b2_ref, w3_ref, b3_ref, o_ref,
                     *, n_split):
    h1 = part_ref[0]
    for s in range(1, n_split):          # static unrolled: n_split is tiny
        h1 = h1 + part_ref[s]
    h1 = jnp.maximum(h1 + b1_ref[...], 0.0)                       # relu(fc1)
    h2 = jnp.dot(h1, w2_ref[...], preferred_element_type=jnp.float32)
    h2 = jnp.maximum(h2 + b2_ref[...], 0.0)                       # relu(fc2)
    # fc3 (out_features == 1): broadcast-multiply + lane reduce.
    out = jnp.sum(h2 * w3_ref[...], axis=-1, keepdims=True) + b3_ref[...]
    o_ref[...] = out.astype(o_ref.dtype)


def _largest_k_tile(n, tk_max, align=128):
    """Largest multiple of `align` that divides n and is <= tk_max (or n itself)."""
    if n <= tk_max:
        return n
    t = (tk_max // align) * align
    while t > 0 and n % t:
        t -= align
    return t if t > 0 else n


def classifier_forward(x, params, *, tk_max=8192, n_split=2,
                       stream_dtype=jnp.bfloat16):
    """Runs the fused classifier kernels.

    x: (B, C, H, W) float32 (NCHW, like PyTorch).
    params: w1 (F,H1), b1 (H1,), w2 (H1,H2), b2 (H2,), w3 (H2,1), b3 (1,)
            (w* already transposed vs. nn.Linear storage: kernel computes x@W+b).
    """
    B = x.shape[0]
    x2d = x.reshape(B, -1)                     # == torch.flatten(x, 1)
    F_in = x2d.shape[1]
    H1 = params["w1"].shape[1]
    H2 = params["w2"].shape[1]

    # --- choose the K split (megacore on v7x) and the K tile size -----------
    if n_split < 1 or F_in % (n_split * 128) != 0:
        n_split = 1
    f_split = F_in // n_split
    tk = _largest_k_tile(f_split, tk_max)
    kps = f_split // tk                        # K tiles per split

    # --- streamed operands: bf16 halves W1 HBM traffic (f32 accumulation) ---
    x_s = x2d.astype(stream_dtype)
    w1 = params["w1"].astype(stream_dtype)
    b1 = params["b1"].reshape(1, H1).astype(jnp.float32)
    w2 = params["w2"].astype(jnp.float32)
    b2 = params["b2"].reshape(1, H2).astype(jnp.float32)
    w3 = params["w3"].reshape(1, H2).astype(jnp.float32)    # (H2,1) -> row
    b3 = params["b3"].reshape(1, 1).astype(jnp.float32)

    # --- explicit VMEM budget: double-buffered x/W1 tiles + headroom --------
    # (v5e default scoped VMEM is 16 MiB; v7x physical is only 64 MiB/TC.)
    itemsize = jnp.dtype(stream_dtype).itemsize
    stream_bytes = 2 * (tk * H1 + B * tk) * itemsize
    vmem_limit = int(min(max(stream_bytes + (8 << 20), 32 << 20), 56 << 20))

    # --- kernel 1: partial fc1 sums, one (B, H1) block per split ------------
    # (If profiling ever shows exposed W1 DMA, add pipeline_mode=pl.Buffered(3)
    #  to the W1 BlockSpec only.)
    partials = pl.pallas_call(
        _fc1_partial_kernel,
        out_shape=jax.ShapeDtypeStruct((n_split, B, H1), jnp.float32),
        grid_spec=pltpu.PrefetchScalarGridSpec(
            num_scalar_prefetch=0,
            grid=(n_split, kps),
            in_specs=[
                pl.BlockSpec((B, tk), lambda s, k: (0, s * kps + k)),    # x
                pl.BlockSpec((tk, H1), lambda s, k: (s * kps + k, 0)),   # W1
            ],
            out_specs=pl.BlockSpec((1, B, H1), lambda s, k: (s, 0, 0)),
            scratch_shapes=[pltpu.VMEM((B, H1), jnp.float32)],
        ),
        compiler_params=pltpu.CompilerParams(
            dimension_semantics=("parallel", "arbitrary"),
            vmem_limit_bytes=vmem_limit),
    )(x_s, w1)

    # --- kernel 2: reduce partials + biases + ReLUs + fc2/fc3 ---------------
    out = pl.pallas_call(
        functools.partial(_epilogue_kernel, n_split=n_split),
        out_shape=jax.ShapeDtypeStruct((B, 1), jnp.float32),
        grid=(1,),
        in_specs=[
            pl.BlockSpec((n_split, B, H1), lambda i: (0, 0, 0)),  # partials
            pl.BlockSpec((1, H1), lambda i: (0, 0)),              # b1
            pl.BlockSpec((H1, H2), lambda i: (0, 0)),             # w2
            pl.BlockSpec((1, H2), lambda i: (0, 0)),              # b2
            pl.BlockSpec((1, H2), lambda i: (0, 0)),              # w3 (row)
            pl.BlockSpec((1, 1), lambda i: (0, 0)),               # b3
        ],
        out_specs=pl.BlockSpec((B, 1), lambda i: (0, 0)),
        compiler_params=pltpu.CompilerParams(
            dimension_semantics=("arbitrary",)),
    )(partials, b1, w2, b2, w3, b3)
    return out


def init_params(key, f_in, h1=128, h2=64):
    """Deterministic init mimicking PyTorch's default uniform(-1/sqrt(in), 1/sqrt(in))."""
    ks = jax.random.split(key, 6)

    def u(k, shape, fan_in):
        bound = 1.0 / jnp.sqrt(fan_in)
        return jax.random.uniform(k, shape, jnp.float32, -bound, bound)

    return {
        "w1": u(ks[0], (f_in, h1), f_in),
        "b1": u(ks[1], (h1,), f_in),
        "w2": u(ks[2], (h1, h2), h1),
        "b2": u(ks[3], (h2,), h1),
        "w3": u(ks[4], (h2, 1), h2),
        "b3": u(ks[5], (1,), h2),
    }


def reference_forward(x, params, fc1_dtype=jnp.float32):
    """Pure-JAX reference (same math as the PyTorch module).

    fc1_dtype=jnp.bfloat16 mirrors the kernel's bf16 W1/x streaming (f32 accum).
    """
    x2d = x.reshape(x.shape[0], -1)
    h1 = jnp.dot(x2d.astype(fc1_dtype), params["w1"].astype(fc1_dtype),
                 preferred_element_type=jnp.float32)
    h1 = jax.nn.relu(h1 + params["b1"])
    h2 = jax.nn.relu(h1 @ params["w2"] + params["b2"])
    return h2 @ params["w3"] + params["b3"]


if __name__ == "__main__":
    key = jax.random.PRNGKey(0)
    k_x, k_p = jax.random.split(key)

    # Small, structure-consistent input: (B=2, C=8, H=16, W=16) -> F = 2048.
    B, C, H, W = 2, 8, 16, 16
    x = jax.random.normal(k_x, (B, C, H, W), jnp.float32)

    params = init_params(k_p, f_in=C * H * W)

    fwd = jax.jit(functools.partial(classifier_forward,
                                    tk_max=8192, n_split=2,
                                    stream_dtype=jnp.bfloat16))
    out = jax.block_until_ready(fwd(x, params))

    # bf16-consistent reference (same fc1 quantization as the kernel)...
    ref_q = reference_forward(x, params, fc1_dtype=jnp.bfloat16)
    # ...and the original f32 module semantics (loose tol for bf16 streaming).
    ref_f = reference_forward(x, params, fc1_dtype=jnp.float32)

    assert out.shape == (B, 1)
    assert jnp.allclose(out, ref_q, atol=2e-3, rtol=2e-3), (out, ref_q)
    assert jnp.allclose(out, ref_f, atol=5e-2, rtol=5e-2), (out, ref_f)

    print("KERNEL_OK")
</pallas_src>

<mosaic_0001>
module attributes {stable_mosaic.version = 11 : i64} {
  func.func @_fc1_partial_kernel(%arg0: i32, %arg1: i32, %arg2: memref<2x1024xbf16, #tpu.memory_space<vmem>>, %arg3: memref<1024x128xbf16, #tpu.memory_space<vmem>>, %arg4: memref<1x2x128xf32, #tpu.memory_space<vmem>>, %arg5: memref<2x128xf32, #tpu.memory_space<vmem>>) attributes {dimension_semantics = [#tpu.dimension_semantics<parallel>, #tpu.dimension_semantics<arbitrary>], iteration_bounds = array<i64: 2, 1>, scalar_prefetch = 0 : i64, scratch_operands = 1 : i64, tpu.core_type = #tpu.core_type<tc>, window_params = [{transform_indices = @transform_0, window_bounds = array<i64: 2, 1024>}, {transform_indices = @transform_1, window_bounds = array<i64: 1024, 128>}, {transform_indices = @transform_2, window_bounds = array<i64: 1, 2, 128>}]} {
    %c0_i32 = arith.constant 0 : i32
    %0 = arith.cmpi eq, %arg1, %c0_i32 : i32
    %1 = arith.extui %0 : i1 to i32
    %c0_i32_0 = arith.constant 0 : i32
    %2 = arith.cmpi ne, %1, %c0_i32_0 : i32
    scf.if %2 {
      %cst_10 = arith.constant 0.000000e+00 : f32
      %12 = vector.broadcast %cst_10 : f32 to vector<2x128xf32>
      %c0_11 = arith.constant 0 : index
      %c0_12 = arith.constant 0 : index
      %13 = vector.load %arg5[%c0_11, %c0_12] : memref<2x128xf32, #tpu.memory_space<vmem>>, vector<2x128xf32>
      tpu.vector_store %arg5[%c0_11, %c0_12], %12 {strides = array<i32>} : memref<2x128xf32, #tpu.memory_space<vmem>>, vector<2x128xf32>,
    } else {
    }
    %c0 = arith.constant 0 : index
    %c0_1 = arith.constant 0 : index
    %3 = vector.load %arg5[%c0, %c0_1] : memref<2x128xf32, #tpu.memory_space<vmem>>, vector<2x128xf32>
    %c0_2 = arith.constant 0 : index
    %c0_3 = arith.constant 0 : index
    %4 = vector.load %arg2[%c0_2, %c0_3] : memref<2x1024xbf16, #tpu.memory_space<vmem>>, vector<2x1024xbf16>
    %c0_4 = arith.constant 0 : index
    %c0_5 = arith.constant 0 : index
    %5 = vector.load %arg3[%c0_4, %c0_5] : memref<1024x128xbf16, #tpu.memory_space<vmem>>, vector<1024x128xbf16>
    %cst = arith.constant dense<0.000000e+00> : vector<2x128xf32>
    %6 = tpu.matmul %4, %5, %cst {dimension_numbers = #tpu.dot_dimension_numbers<[1], [0], [0], [1], [0, 0, 1, 1], [], []>} : vector<2x1024xbf16>, vector<1024x128xbf16>, vector<2x128xf32> -> vector<2x128xf32>
    %7 = arith.addf %3, %6 : vector<2x128xf32>
    %c0_6 = arith.constant 0 : index
    %c0_7 = arith.constant 0 : index
    %8 = vector.load %arg5[%c0_6, %c0_7] : memref<2x128xf32, #tpu.memory_space<vmem>>, vector<2x128xf32>
    tpu.vector_store %arg5[%c0_6, %c0_7], %7 {strides = array<i32>} : memref<2x128xf32, #tpu.memory_space<vmem>>, vector<2x128xf32>,
    %c0_i32_8 = arith.constant 0 : i32
    %9 = arith.cmpi eq, %arg1, %c0_i32_8 : i32
    %10 = arith.extui %9 : i1 to i32
    %c0_i32_9 = arith.constant 0 : i32
    %11 = arith.cmpi ne, %10, %c0_i32_9 : i32
    scf.if %11 {
      %c0_10 = arith.constant 0 : index
      %c0_11 = arith.constant 0 : index
      %12 = vector.load %arg5[%c0_10, %c0_11] : memref<2x128xf32, #tpu.memory_space<vmem>>, vector<2x128xf32>
      %13 = vector.shape_cast %12 : vector<2x128xf32> to vector<1x2x128xf32>
      %c0_12 = arith.constant 0 : index
      %c0_13 = arith.constant 0 : index
      %c0_14 = arith.constant 0 : index
      %14 = vector.load %arg4[%c0_12, %c0_13, %c0_14] : memref<1x2x128xf32, #tpu.memory_space<vmem>>, vector<1x2x128xf32>
      tpu.vector_store %arg4[%c0_12, %c0_13, %c0_14], %13 {strides = array<i32>} : memref<1x2x128xf32, #tpu.memory_space<vmem>>, vector<1x2x128xf32>,
    } else {
    }
    return
  }
  func.func @transform_0(%arg0: i32, %arg1: i32) -> (i32, i32) {
    %c1_i32 = arith.constant 1 : i32
    %0 = arith.muli %arg0, %c1_i32 : i32
    %1 = arith.addi %0, %arg1 : i32
    %c0_i32 = arith.constant 0 : i32
    %c0_i32_0 = arith.constant 0 : i32
    return %c0_i32, %1 : i32, i32
  }
  func.func @transform_1(%arg0: i32, %arg1: i32) -> (i32, i32) {
    %c1_i32 = arith.constant 1 : i32
    %0 = arith.muli %arg0, %c1_i32 : i32
    %1 = arith.addi %0, %arg1 : i32
    %c0_i32 = arith.constant 0 : i32
    %c0_i32_0 = arith.constant 0 : i32
    return %1, %c0_i32 : i32, i32
  }
  func.func @transform_2(%arg0: i32, %arg1: i32) -> (i32, i32, i32) {
    %c0_i32 = arith.constant 0 : i32
    %c0_i32_0 = arith.constant 0 : i32
    %c0_i32_1 = arith.constant 0 : i32
    return %arg0, %c0_i32, %c0_i32_0 : i32, i32, i32
  }
}

module attributes {stable_mosaic.version = 11 : i64} {
  func.func @_epilogue_kernel(%arg0: i32, %arg1: memref<2x2x128xf32, #tpu.memory_space<vmem>>, %arg2: memref<1x128xf32, #tpu.memory_space<vmem>>, %arg3: memref<128x64xf32, #tpu.memory_space<vmem>>, %arg4: memref<1x64xf32, #tpu.memory_space<vmem>>, %arg5: memref<1x64xf32, #tpu.memory_space<vmem>>, %arg6: memref<1x1xf32, #tpu.memory_space<vmem>>, %arg7: memref<2x1xf32, #tpu.memory_space<vmem>>) attributes {dimension_semantics = [#tpu.dimension_semantics<arbitrary>], iteration_bounds = array<i64: 1>, scalar_prefetch = 0 : i64, scratch_operands = 0 : i64, tpu.core_type = #tpu.core_type<tc>, window_params = [{pipeline_mode = #tpu.pipeline_mode<synchronous>, transform_indices = @transform_0, window_bounds = array<i64: 2, 2, 128>}, {pipeline_mode = #tpu.pipeline_mode<synchronous>, transform_indices = @transform_1, window_bounds = array<i64: 1, 128>}, {pipeline_mode = #tpu.pipeline_mode<synchronous>, transform_indices = @transform_2, window_bounds = array<i64: 128, 64>}, {pipeline_mode = #tpu.pipeline_mode<synchronous>, transform_indices = @transform_3, window_bounds = array<i64: 1, 64>}, {pipeline_mode = #tpu.pipeline_mode<synchronous>, transform_indices = @transform_4, window_bounds = array<i64: 1, 64>}, {pipeline_mode = #tpu.pipeline_mode<synchronous>, transform_indices = @transform_5, window_bounds = array<i64: 1, 1>}, {pipeline_mode = #tpu.pipeline_mode<synchronous>, transform_indices = @transform_6, window_bounds = array<i64: 2, 1>}]} {
    %c0 = arith.constant 0 : index
    %c0_0 = arith.constant 0 : index
    %c0_1 = arith.constant 0 : index
    %0 = vector.load %arg1[%c0, %c0_0, %c0_1] : memref<2x2x128xf32, #tpu.memory_space<vmem>>, vector<1x2x128xf32>
    %1 = vector.shape_cast %0 : vector<1x2x128xf32> to vector<2x128xf32>
    %c1 = arith.constant 1 : index
    %c0_2 = arith.constant 0 : index
    %c0_3 = arith.constant 0 : index
    %2 = vector.load %arg1[%c1, %c0_2, %c0_3] : memref<2x2x128xf32, #tpu.memory_space<vmem>>, vector<1x2x128xf32>
    %3 = vector.shape_cast %2 : vector<1x2x128xf32> to vector<2x128xf32>
    %4 = arith.addf %1, %3 : vector<2x128xf32>
    %c0_4 = arith.constant 0 : index
    %c0_5 = arith.constant 0 : index
    %5 = vector.load %arg2[%c0_4, %c0_5] : memref<1x128xf32, #tpu.memory_space<vmem>>, vector<1x128xf32>
    %6 = vector.broadcast %5 : vector<1x128xf32> to vector<2x128xf32>
    %7 = arith.addf %4, %6 : vector<2x128xf32>
    %cst = arith.constant 0.000000e+00 : f32
    %8 = vector.broadcast %cst : f32 to vector<2x128xf32>
    %9 = arith.maximumf %7, %8 : vector<2x128xf32>
    %c0_6 = arith.constant 0 : index
    %c0_7 = arith.constant 0 : index
    %10 = vector.load %arg3[%c0_6, %c0_7] : memref<128x64xf32, #tpu.memory_space<vmem>>, vector<128x64xf32>
    %cst_8 = arith.constant dense<0.000000e+00> : vector<2x64xf32>
    %11 = tpu.matmul %9, %10, %cst_8 {dimension_numbers = #tpu.dot_dimension_numbers<[1], [0], [0], [1], [0, 0, 1, 1], [], []>} : vector<2x128xf32>, vector<128x64xf32>, vector<2x64xf32> -> vector<2x64xf32>
    %c0_9 = arith.constant 0 : index
    %c0_10 = arith.constant 0 : index
    %12 = vector.load %arg4[%c0_9, %c0_10] : memref<1x64xf32, #tpu.memory_space<vmem>>, vector<1x64xf32>
    %13 = vector.broadcast %12 : vector<1x64xf32> to vector<2x64xf32>
    %14 = arith.addf %11, %13 : vector<2x64xf32>
    %cst_11 = arith.constant 0.000000e+00 : f32
    %15 = vector.broadcast %cst_11 : f32 to vector<2x64xf32>
    %16 = arith.maximumf %14, %15 : vector<2x64xf32>
    %c0_12 = arith.constant 0 : index
    %c0_13 = arith.constant 0 : index
    %17 = vector.load %arg5[%c0_12, %c0_13] : memref<1x64xf32, #tpu.memory_space<vmem>>, vector<1x64xf32>
    %18 = vector.broadcast %17 : vector<1x64xf32> to vector<2x64xf32>
    %19 = arith.mulf %16, %18 : vector<2x64xf32>
    %cst_14 = arith.constant dense<0.000000e+00> : vector<2xf32>
    %20 = vector.multi_reduction <add>, %19, %cst_14 [1] : vector<2x64xf32> to vector<2xf32>
    %21 = vector.shape_cast %20 : vector<2xf32> to vector<2x1xf32>
    %c0_15 = arith.constant 0 : index
    %c0_16 = arith.constant 0 : index
    %22 = vector.load %arg6[%c0_15, %c0_16] : memref<1x1xf32, #tpu.memory_space<vmem>>, vector<1x1xf32>
    %23 = vector.broadcast %22 : vector<1x1xf32> to vector<2x1xf32>
    %24 = arith.addf %21, %23 : vector<2x1xf32>
    %c0_17 = arith.constant 0 : index
    %c0_18 = arith.constant 0 : index
    %25 = vector.load %arg7[%c0_17, %c0_18] : memref<2x1xf32, #tpu.memory_space<vmem>>, vector<2x1xf32>
    tpu.vector_store %arg7[%c0_17, %c0_18], %24 {strides = array<i32>} : memref<2x1xf32, #tpu.memory_space<vmem>>, vector<2x1xf32>,
    return
  }
  func.func @transform_0(%arg0: i32) -> (i32, i32, i32) {
    %c0_i32 = arith.constant 0 : i32
    %c0_i32_0 = arith.constant 0 : i32
    %c0_i32_1 = arith.constant 0 : i32
    %c0_i32_2 = arith.constant 0 : i32
    return %c0_i32, %c0_i32_0, %c0_i32_1 : i32, i32, i32
  }
  func.func @transform_1(%arg0: i32) -> (i32, i32) {
    %c0_i32 = arith.constant 0 : i32
    %c0_i32_0 = arith.constant 0 : i32
    %c0_i32_1 = arith.constant 0 : i32
    return %c0_i32, %c0_i32_0 : i32, i32
  }
  func.func @transform_2(%arg0: i32) -> (i32, i32) {
    %c0_i32 = arith.constant 0 : i32
    %c0_i32_0 = arith.constant 0 : i32
    %c0_i32_1 = arith.constant 0 : i32
    return %c0_i32, %c0_i32_0 : i32, i32
  }
  func.func @transform_3(%arg0: i32) -> (i32, i32) {
    %c0_i32 = arith.constant 0 : i32
    %c0_i32_0 = arith.constant 0 : i32
    %c0_i32_1 = arith.constant 0 : i32
    return %c0_i32, %c0_i32_0 : i32, i32
  }
  func.func @transform_4(%arg0: i32) -> (i32, i32) {
    %c0_i32 = arith.constant 0 : i32
    %c0_i32_0 = arith.constant 0 : i32
    %c0_i32_1 = arith.constant 0 : i32
    return %c0_i32, %c0_i32_0 : i32, i32
  }
  func.func @transform_5(%arg0: i32) -> (i32, i32) {
    %c0_i32 = arith.constant 0 : i32
    %c0_i32_0 = arith.constant 0 : i32
    %c0_i32_1 = arith.constant 0 : i32
    return %c0_i32, %c0_i32_0 : i32, i32
  }
  func.func @transform_6(%arg0: i32) -> (i32, i32) {
    %c0_i32 = arith.constant 0 : i32
    %c0_i32_0 = arith.constant 0 : i32
    %c0_i32_1 = arith.constant 0 : i32
    return %c0_i32, %c0_i32_0 : i32, i32
  }
}

</mosaic_0001>

<bundles_post_ra>
// kernel: classifier_forward.3
= control target key start
LH: loop header
LB: loop body
LE: loop exit
PB: predicated region body
PF: predicated region fallthrough
CT: control target
= control target key end

     0   :  { %v242_v0 = vmov 0.0|0.0   ;;  %vm243_vm0 = vmmov 0   ;;  %v244_v4 = vmov 0.0   ;;  %vm140_vm1 = vcmask 517120   ;;  %s349_s2 = inlined_call_operand.vmem [shape: f32[128,64], index: 2, kind: input, shape index: {}]   ;;  %s350_s0 = inlined_call_operand.vmem [shape: f32[2,2,128], index: 0, kind: input, shape index: {}]   ;;  %s351_s1 = inlined_call_operand.vmem [shape: f32[1,128], index: 1, kind: input, shape index: {}]   ;;  %s352_s5 = inlined_call_operand.<no memory space> [shape: f32[1,1], index: 5, kind: input, shape index: {}]   ;;  %s353_s3 = inlined_call_operand.vmem [shape: f32[1,64], index: 3, kind: input, shape index: {}]   ;;  %s354_s4 = inlined_call_operand.vmem [shape: f32[1,64], index: 4, kind: input, shape index: {}]   ;;  %s355_s6 = inlined_call_operand.vmem [shape: f32[2,1], index: 6, kind: output, shape index: {}]  }
   0x1   :  { %215 = vmatprep.subr.bf16.mxu0 %v242_v0  ;;  %v38_v1 = vld [vmem:[%s349_s2] sm:$0xff]  ;;  %v39_v2 = vld [vmem:[%s349_s2 + $0x8] sm:$0xff]  ;;  %v40_v3 = vld [vmem:[%s349_s2 + $0x10] sm:$0xff]  ;;  %212 = vmatprep.mubr.msk.f32.mxu0 %vm243_vm0, %v244_v4  ;;  %v11_v32 = vstv %s352_s5  ;;  %vm152_vm2 = vcmask 1024  }
   0x2   :  { %v216_v5 = vpack.c.bf16 %v39_v2, %v38_v1  ;;  %v41_v6 = vld [vmem:[%s349_s2 + $0x18] sm:$0xff]  ;;  %v42_v8 = vld [vmem:[%s349_s2 + $0x20] sm:$0xff]  ;;  %v43_v9 = vld [vmem:[%s349_s2 + $0x28] sm:$0xff]  ;;  %12 = vst [vmem:[#allocation2] sm:$0x1] %v11_v32 }
   0x3   :  { %v219_v7 = vpack.c.bf16 %v41_v6, %v40_v3  ;;  %v222_v10 = vpack.c.bf16 %v43_v9, %v42_v8  ;;  %v44_v11 = vld [vmem:[%s349_s2 + $0x30] sm:$0xff]  ;;  %v45_v12 = vld [vmem:[%s349_s2 + $0x38] sm:$0xff]  ;;  %v46_v14 = vld [vmem:[%s349_s2 + $0x40] sm:$0xff] }
   0x4   :  { %217 = vmatpush3.bf16.msra.mxu0 %v216_v5  ;;  %v225_v13 = vpack.c.bf16 %v45_v12, %v44_v11  ;;  %v47_v15 = vld [vmem:[%s349_s2 + $0x48] sm:$0xff]  ;;  %v48_v17 = vld [vmem:[%s349_s2 + $0x50] sm:$0xff]  ;;  %v49_v18 = vld [vmem:[%s349_s2 + $0x58] sm:$0xff] }
   0x5   :  { %218 = vmatprep.subr.bf16.mxu0 %v242_v0  ;;  %v228_v16 = vpack.c.bf16 %v47_v15, %v46_v14  ;;  %v231_v19 = vpack.c.bf16 %v49_v18, %v48_v17  ;;  %v25_v20 = vld [vmem:[%s350_s0] sm:$0x3]  ;;  %v158_v21 = vld [vmem:[%s350_s0 + $0x2] sm:$0x3]  ;;  %v51_v23 = vld [vmem:[%s349_s2 + $0x68] sm:$0xff] }
   0x6   :  { %v50_v22 = vld [vmem:[%s349_s2 + $0x60] sm:$0xff]  ;;  %v28_v24 = vadd.f32 %v158_v21, %v25_v20  ;;  %v52_v27 = vld [vmem:[%s349_s2 + $0x70] sm:$0xff]  ;;  %v53_v28 = vld [vmem:[%s349_s2 + $0x78] sm:$0xff] }
   0x7   :  { %v234_v25 = vpack.c.bf16 %v51_v23, %v50_v22  ;;  %v159_v26 = vld [vmem:[%s351_s1] ss:$0 sm:$0xff]  ;;  %v237_v30 = vpack.c.bf16 %v53_v28, %v52_v27 }
   0x8   :  { %220 = vmatpush3.bf16.msra.mxu0 %v219_v7  ;;  %v36_v29 = vadd.f32 %v159_v26, %v28_v24  ;;  %v160_v33 = vld [vmem:[%s353_s3] ss:$0 sm:$0xff] }
   0x9   :  { %221 = vmatprep.subr.bf16.mxu0 %v242_v0  ;;  %v161_v37 = vld [vmem:[%s354_s4] ss:$0 sm:$0xff] }
   0xa   :  { %v37_v31 = vmax.f32 %v36_v29, 0.0  ;;  %v162_v41 = vld [vmem:[#allocation2] ss:$0 sm:$0xff] }
   0xc   :  { %223 = vmatpush3.bf16.msra.mxu0 %v222_v10 }
   0xd   :  { %224 = vmatprep.subr.bf16.mxu0 %v242_v0 }
  0x10   :  { %226 = vmatpush3.bf16.msra.mxu0 %v225_v13 }
  0x11   :  { %227 = vmatprep.subr.bf16.mxu0 %v242_v0 }
  0x14   :  { %229 = vmatpush3.bf16.msra.mxu0 %v228_v16 }
  0x15   :  { %230 = vmatprep.subr.bf16.mxu0 %v242_v0 }
  0x18   :  { %232 = vmatpush3.bf16.msra.mxu0 %v231_v19 }
  0x19   :  { %233 = vmatprep.subr.bf16.mxu0 %v242_v0 }
  0x1c   :  { %235 = vmatpush3.bf16.msra.mxu0 %v234_v25 }
  0x1d   :  { %236 = vmatprep.subr.bf16.mxu0 %v242_v0 }
  0x20   :  { %238 = vmatpush3.bf16.msra.mxu0 %v237_v30 }
  0x23   :  { %213 = vmatmul.mubr.f32.vlgmr.msra.gmra.mrb[0].mxu0 %v37_v31 }
  0xf6   :  { %v127_v34 = vpop.f32.mrb[0].mxu0 }
  0xf7   :  { %v128_v35 = vadd.f32 %v160_v33, %v127_v34  ;;  %v214_v36 = vpop.f32.mrb[1].mxu0 }
  0xf9   :  { %v131_v38 = vmax.f32 %v128_v35, 0.0 }
  0xfb   :  { %v139_v39 = vmul.f32 %v161_v37, %v131_v38 }
  0xfd   :  { %v141_v40 = vsel %vm140_vm1, %v139_v39, 0.0 }
  0xfe   :  { %142 = vadd.xlane.f32.xlu0 %v141_v40 }
 0x18b   :  { %v143_v42 = vpop.xlane.xlu0 %142 }
 0x18c   :  { %v151_v43 = vadd.f32 %v162_v41, %v143_v42 }
 0x18e   :  { %153 = vst.msk [vmem:[%s355_s6] sm:$0x3] %vm152_vm2, %v151_v43 }

// kernel: classifier_forward.2
= control target key start
LH: loop header
LB: loop body
LE: loop exit
PB: predicated region body
PF: predicated region fallthrough
CT: control target
= control target key end

     0   :  { %s1299_s9 = smov 0   ;;  %s1301_s10 = smov 0   ;;  %s1420_s0 = inlined_call_operand.vmem [shape: bf16[2,2048], index: 0, kind: input, shape index: {}]   ;;  %s1421_s1 = inlined_call_operand.vmem [shape: bf16[2048,128], index: 1, kind: input, shape index: {}]   ;;  %s1422_s2 = inlined_call_operand.vmem [shape: f32[2,2,128], index: 2, kind: output, shape index: {}]  }
   0x1   :  { %s1303_s11 = smov 0  }
   0x2 LB: > { %s24_s12 = sadd.s32 1, %s1276_s10  ;;  %p1008_p0 = scmp.ge.s32.totalorder %s1280_s11, 1  ;;  %s1280_s11 = sphi %s1303_s11, %s12_s11   ;;  %s1276_s10 = sphi %s1301_s10, %s1424_s10   ;;  %s1272_s9 = sphi %s1299_s9, %s1423_s9  }
   0x3   : > { %p26_p1 = scmp.ge.s32.totalorder %s24_s12, 2  ;;  %p143_p2 = scmp.lt.s32.totalorder %s1280_s11, 3 }
   0x5   : > { %s1426_s12 = smov (%p26_p1, %s24_s12), 0  ;;  %p144_p3 = pnand %p1008_p0, %p143_p2 }
   0x6   : > { %s1010_s13 = sshll.u32 (!%p144_p3), %s1272_s9, 7  ;;  %s1009_s18 = sshll.u32 (!%p144_p3), %s1272_s9, 3  ;;  %v330_v21 = vlaneseq (!%p144_p3)  ;;  %v1282_v23 = vmov (!%p144_p3), 1966171168  }
   0x7   : > { %147 = sbr.rel (%p144_p3) target bundleno = 313 (0x139), region = 28  ;;  %p179_p4 = scmp.lt.s32.totalorder (!%p144_p3), %s1010_s13, 255  ;;  %v328_v24 = vunpack.c.l.s4 (!%p144_p3), %v1282_v23 }
   0x8   : > { %p172_p5 = scmp.lt.s32.totalorder (!%p144_p3), %s1009_s18, 15  ;;  %v331_v28 = vshrl.u32 (!%p144_p3), %v330_v21, 7  ;;  %p185_p6 = scmp.lt.s32.totalorder (!%p144_p3), %s1272_s9, 1 }
   0x9   : > { %v329_v30 = vunpack.c.0.s8 (!%p144_p3), %v328_v24 }
   0xb   : > { %v1359_v35 = vsub.s32 (!%p144_p3), %v329_v30, %v331_v28 }
   0xe   : > { %s1428_s13 = smov (!%p179_p4, %s1010_s13), 255  ;;  %s1430_s18 = smov (!%p172_p5, %s1009_s18), 15 }
   0xf   : > { %s1011_s14 = sshll.u32 %s1428_s13, 2  ;;  %s174_s21 = scalar_lea.vmem %s1420_s0, %s1430_s18 }
  0x10   : > { %s1323_s17 = scalar_lea.vmem %s1421_s1, %s1011_s14  ;;  %v196_v38 = vld [vmem:[%s174_s21] sm:$0xff]  ;;  %s1432_s9 = smov (!%p185_p6, %s1272_s9), 1 }
  0x11   : > { %v1193_v0 = vld [vmem:[%s1323_s17 + $0x40] sm:$0xff]   ;;  %v1197_v4 = vld [vmem:[%s1323_s17 + $0x48] sm:$0xff]   ;;  %v1201_v8 = vld [vmem:[%s1323_s17 + $0x50] sm:$0xff]   ;;  %v326_v39 = vcombine.high %v196_v38, %v196_v38  ;;  %v333_v40 = vrot.slane %v196_v38, %v1359_v35  ;;  %s1012_s22 = sshll.u32 %s1432_s9, 1 }
  0x12   : > { %v1194_v1 = vld [vmem:[%s1323_s17 + $0xc0] sm:$0xff]   ;;  %1079 = vmatprep.subr.bf16.mxu0 %v1193_v0  ;;  %v1198_v5 = vld [vmem:[%s1323_s17 + $0xc8] sm:$0xff]   ;;  %v1202_v9 = vld [vmem:[%s1323_s17 + $0xd0] sm:$0xff]   ;;  %s188_s25 = scalar_lea.vmem %s1422_s2, %s1012_s22 }
  0x13   : > { %v1195_v2 = vld [vmem:[%s1323_s17] sm:$0xff]   ;;  %1101 = vmatprep.subr.bf16.mxu1 %v1194_v1  ;;  %v1199_v6 = vld [vmem:[%s1323_s17 + $0x8] sm:$0xff]   ;;  %v1203_v10 = vld [vmem:[%s1323_s17 + $0x10] sm:$0xff]   ;;  %v341_v43 = vcombine.high %v333_v40, %v333_v40  ;;  %v349_v44 = vrot.slane %v333_v40, %v1359_v35  ;;  %v1368_v45 = vrot.slane %v326_v39, %v1359_v35 }
  0x14   : > { %v1196_v3 = vld [vmem:[%s1323_s17 + $0x80] sm:$0xff]   ;;  %1080 = vmatpush3.bf16.msra.mxu0 %v1195_v2  ;;  %v1200_v7 = vld [vmem:[%s1323_s17 + $0x88] sm:$0xff]   ;;  %v1204_v11 = vld [vmem:[%s1323_s17 + $0x90] sm:$0xff]  }
  0x15   : > { %1102 = vmatpush3.bf16.msra.mxu1 %v1196_v3  ;;  %1081 = vmatprep.subr.bf16.mxu0 %v1197_v4  ;;  %v1205_v12 = vld [vmem:[%s1323_s17 + $0x58] sm:$0xff]   ;;  %v1209_v16 = vld [vmem:[%s1323_s17 + $0x60] sm:$0xff]   ;;  %v1213_v20 = vld [vmem:[%s1323_s17 + $0x68] sm:$0xff]   ;;  %v363_v46 = vrot.slane %v341_v43, %v1359_v35  ;;  %v342_v48 = vcombine.high %v1368_v45, %v1368_v45  ;;  %v371_v49 = vcombine.high %v349_v44, %v349_v44 }
  0x16   : > { %1103 = vmatprep.subr.bf16.mxu1 %v1198_v5  ;;  %v1206_v13 = vld [vmem:[%s1323_s17 + $0xd8] sm:$0xff]   ;;  %v1210_v17 = vld [vmem:[%s1323_s17 + $0xe0] sm:$0xff]   ;;  %v1214_v22 = vld [vmem:[%s1323_s17 + $0xe8] sm:$0xff]  }
  0x17   : > { %v1207_v14 = vld [vmem:[%s1323_s17 + $0x18] sm:$0xff]   ;;  %v1211_v18 = vld [vmem:[%s1323_s17 + $0x20] sm:$0xff]   ;;  %v1215_v25 = vld [vmem:[%s1323_s17 + $0x28] sm:$0xff]   ;;  %799 = vmatprep.mubr.bf16.mxu0 %v363_v46  ;;  %v373_v51 = vcombine.high %v363_v46, %v363_v46  ;;  %v370_v53 = vrot.slane %v342_v48, %v1359_v35 }
  0x18   : > { %1082 = vmatpush3.bf16.msra.mxu0 %v1199_v6  ;;  %v1208_v15 = vld [vmem:[%s1323_s17 + $0x98] sm:$0xff]   ;;  %v1212_v19 = vld [vmem:[%s1323_s17 + $0xa0] sm:$0xff]   ;;  %v1216_v26 = vld [vmem:[%s1323_s17 + $0xa8] sm:$0xff]  }
  0x19   : > { %1104 = vmatpush3.bf16.msra.mxu1 %v1200_v7  ;;  %1083 = vmatprep.subr.bf16.mxu0 %v1201_v8  ;;  %v1217_v27 = vld [vmem:[%s1323_s17 + $0x70] sm:$0xff]   ;;  %v1221_v33 = vld [vmem:[%s1323_s17 + $0x78] sm:$0xff]   ;;  %v1226_v41 = vld [vmem:[%s1323_s17 + $0x140] sm:$0xff]   ;;  %v374_v56 = vcombine.high %v370_v53, %v370_v53 }
  0x1a   : > { %1105 = vmatprep.subr.bf16.mxu1 %v1202_v9  ;;  %v1218_v29 = vld [vmem:[%s1323_s17 + $0xf0] sm:$0xff]   ;;  %v1222_v34 = vld [vmem:[%s1323_s17 + $0xf8] sm:$0xff]   ;;  %v1227_v42 = vld [vmem:[%s1323_s17 + $0x1c0] sm:$0xff]   ;;  %839 = vmatprep.mubr.bf16.mxu1 %v373_v51 }
  0x1b   : > { %v1219_v31 = vld [vmem:[%s1323_s17 + $0x30] sm:$0xff]   ;;  %v1223_v36 = vld [vmem:[%s1323_s17 + $0x38] sm:$0xff]   ;;  %v1228_v47 = vld [vmem:[%s1323_s17 + $0x100] sm:$0xff]  }
  0x1c   : > { %1084 = vmatpush3.bf16.msra.mxu0 %v1203_v10  ;;  %v1220_v32 = vld [vmem:[%s1323_s17 + $0xb0] sm:$0xff]   ;;  %v1224_v37 = vld [vmem:[%s1323_s17 + $0xb8] sm:$0xff]   ;;  %v1230_v50 = vld [vmem:[%s1323_s17 + $0x148] sm:$0xff]  }
  0x1d   : > { %1106 = vmatpush3.bf16.msra.mxu1 %v1204_v11  ;;  %1085 = vmatprep.subr.bf16.mxu0 %v1205_v12  ;;  %v1229_v52 = vld [vmem:[%s1323_s17 + $0x180] sm:$0xff]   ;;  %v1231_v54 = vld [vmem:[%s1323_s17 + $0x1c8] sm:$0xff]   ;;  %v1234_v57 = vld [vmem:[%s1323_s17 + $0x150] sm:$0xff]  }
  0x1e   : > { %1107 = vmatprep.subr.bf16.mxu1 %v1206_v13  ;;  %v1232_v55 = vld [vmem:[%s1323_s17 + $0x108] sm:$0xff]   ;;  %v1235_v59 = vld [vmem:[%s1323_s17 + $0x1d0] sm:$0xff]   ;;  %v1238_v61 = vld [vmem:[%s1323_s17 + $0x158] sm:$0xff]  }
  0x1f   : > { %v1233_v58 = vld [vmem:[%s1323_s17 + $0x188] sm:$0xff]   ;;  %v1236_v60 = vld [vmem:[%s1323_s17 + $0x110] sm:$0xff]   ;;  %v1239_v63 = vld [vmem:[%s1323_s17 + $0x1d8] sm:$0xff]  }
  0x20   : > { %1086 = vmatpush3.bf16.msra.mxu0 %v1207_v14  ;;  %v1237_v62 = vld [vmem:[%s1323_s17 + $0x190] sm:$0xff]   ;;  %v1240_v0 = vld [vmem:[%s1323_s17 + $0x118] sm:$0xff]   ;;  %v1242_v1 = vld [vmem:[%s1323_s17 + $0x160] sm:$0xff]  }
  0x21   : > { %1108 = vmatpush3.bf16.msra.mxu1 %v1208_v15  ;;  %1087 = vmatprep.subr.bf16.mxu0 %v1209_v16  ;;  %v1241_v2 = vld [vmem:[%s1323_s17 + $0x198] sm:$0xff]   ;;  %v1243_v3 = vld [vmem:[%s1323_s17 + $0x1e0] sm:$0xff]   ;;  %v1246_v5 = vld [vmem:[%s1323_s17 + $0x168] sm:$0xff]  }
  0x22   : > { %1109 = vmatprep.subr.bf16.mxu1 %v1210_v17  ;;  %v1244_v4 = vld [vmem:[%s1323_s17 + $0x120] sm:$0xff]   ;;  %v1247_v7 = vld [vmem:[%s1323_s17 + $0x1e8] sm:$0xff]   ;;  %v1250_v9 = vld [vmem:[%s1323_s17 + $0x170] sm:$0xff]   ;;  %v356_v17 = vrot.slane %v1368_v45, %v1359_v35 }
  0x23   : > { %v1245_v6 = vld [vmem:[%s1323_s17 + $0x1a0] sm:$0xff]   ;;  %v1248_v8 = vld [vmem:[%s1323_s17 + $0x128] sm:$0xff]   ;;  %v1251_v11 = vld [vmem:[%s1323_s17 + $0x1f0] sm:$0xff]  }
  0x24   : > { %1088 = vmatpush3.bf16.msra.mxu0 %v1211_v18  ;;  %v1249_v10 = vld [vmem:[%s1323_s17 + $0x1a8] sm:$0xff]   ;;  %v1252_v12 = vld [vmem:[%s1323_s17 + $0x130] sm:$0xff]   ;;  %v1254_v13 = vld [vmem:[%s1323_s17 + $0x178] sm:$0xff]  }
  0x25   : > { %1110 = vmatpush3.bf16.msra.mxu1 %v1212_v19  ;;  %1089 = vmatprep.subr.bf16.mxu0 %v1213_v20  ;;  %v1253_v14 = vld [vmem:[%s1323_s17 + $0x1b0] sm:$0xff]   ;;  %v1255_v15 = vld [vmem:[%s1323_s17 + $0x1f8] sm:$0xff]   ;;  %v372_v19 = vcombine.high %v356_v17, %v356_v17  ;;  %v1283_v20 = vmov 0.0  }
  0x26   : > { %1111 = vmatprep.subr.bf16.mxu1 %v1214_v22  ;;  %v1256_v16 = vld [vmem:[%s1323_s17 + $0x138] sm:$0xff]   ;;  %194 = vst [vmem:[#allocation2] sm:$0x3] %v1283_v20 }
  0x27   : > { %v1257_v18 = vld [vmem:[%s1323_s17 + $0x1b8] sm:$0xff]  }
  0x28   : > { %1090 = vmatpush3.bf16.msra.mxu0 %v1215_v25 }
  0x29   : > { %1112 = vmatpush3.bf16.msra.mxu1 %v1216_v26  ;;  %1091 = vmatprep.subr.bf16.mxu0 %v1217_v27 }
  0x2a   : > { %1113 = vmatprep.subr.bf16.mxu1 %v1218_v29 }
  0x2c   : > { %1092 = vmatpush3.bf16.msra.mxu0 %v1219_v31 }
  0x2d   : > { %1114 = vmatpush3.bf16.msra.mxu1 %v1220_v32  ;;  %1093 = vmatprep.subr.bf16.mxu0 %v1221_v33 }
  0x2e   : > { %1115 = vmatprep.subr.bf16.mxu1 %v1222_v34 }
  0x30   : > { %1094 = vmatpush3.bf16.msra.mxu0 %v1223_v36 }
  0x31   : > { %1116 = vmatpush3.bf16.msra.mxu1 %v1224_v37  ;;  %1123 = vmatprep.subr.bf16.mxu0 %v1226_v41 }
  0x32   : > { %1145 = vmatprep.subr.bf16.mxu1 %v1227_v42  ;;  %v195_v42 = vld [vmem:[#allocation2] sm:$0x3] }
  0x33   : > { %800 = vmatmul.mubr.bf16.vlgmr.msra.gmra.mrb[0].mxu0 %v349_v44 }
  0x34   : > { %1124 = vmatpush3.bf16.msra.mxu0 %v1228_v47  ;;  %840 = vmatmul.mubr.bf16.vlgmr.msra.gmra.mrb[0].mxu1 %v371_v49 }
  0x35   : > { %1125 = vmatprep.subr.bf16.mxu0 %v1230_v50  ;;  %1146 = vmatpush3.bf16.msra.mxu1 %v1229_v52 }
  0x36   : > { %879 = vmatprep.mubr.bf16.mxu0 %v370_v53  ;;  %1147 = vmatprep.subr.bf16.mxu1 %v1231_v54 }
  0x37   : > { %919 = vmatprep.mubr.bf16.mxu1 %v374_v56 }
  0x38   : > { %1126 = vmatpush3.bf16.msra.mxu0 %v1232_v55 }
  0x39   : > { %1127 = vmatprep.subr.bf16.mxu0 %v1234_v57  ;;  %1148 = vmatpush3.bf16.msra.mxu1 %v1233_v58 }
  0x3a   : > { %1149 = vmatprep.subr.bf16.mxu1 %v1235_v59 }
  0x3c   : > { %1128 = vmatpush3.bf16.msra.mxu0 %v1236_v60 }
  0x3d   : > { %1129 = vmatprep.subr.bf16.mxu0 %v1238_v61  ;;  %1150 = vmatpush3.bf16.msra.mxu1 %v1237_v62 }
  0x3e   : > { %1151 = vmatprep.subr.bf16.mxu1 %v1239_v63 }
  0x40   : > { %1130 = vmatpush3.bf16.msra.mxu0 %v1240_v0 }
  0x41   : > { %1131 = vmatprep.subr.bf16.mxu0 %v1242_v1  ;;  %1152 = vmatpush3.bf16.msra.mxu1 %v1241_v2 }
  0x42   : > { %1153 = vmatprep.subr.bf16.mxu1 %v1243_v3 }
  0x44   : > { %1132 = vmatpush3.bf16.msra.mxu0 %v1244_v4 }
  0x45   : > { %1133 = vmatprep.subr.bf16.mxu0 %v1246_v5  ;;  %1154 = vmatpush3.bf16.msra.mxu1 %v1245_v6 }
  0x46   : > { %1155 = vmatprep.subr.bf16.mxu1 %v1247_v7 }
  0x48   : > { %1134 = vmatpush3.bf16.msra.mxu0 %v1248_v8 }
  0x49   : > { %1135 = vmatprep.subr.bf16.mxu0 %v1250_v9  ;;  %1156 = vmatpush3.bf16.msra.mxu1 %v1249_v10 }
  0x4a   : > { %1157 = vmatprep.subr.bf16.mxu1 %v1251_v11 }
  0x4c   : > { %1136 = vmatpush3.bf16.msra.mxu0 %v1252_v12 }
  0x4d   : > { %1137 = vmatprep.subr.bf16.mxu0 %v1254_v13  ;;  %1158 = vmatpush3.bf16.msra.mxu1 %v1253_v14 }
  0x4e   : > { %1159 = vmatprep.subr.bf16.mxu1 %v1255_v15 }
  0x50   : > { %1138 = vmatpush3.bf16.msra.mxu0 %v1256_v16 }
  0x51   : > { %1160 = vmatpush3.bf16.msra.mxu1 %v1257_v18 }
  0x53   : > { %880 = vmatmul.mubr.bf16.vlgmr.msra.gmra.mrb[4].mxu0 %v356_v17 }
  0x54   : > { %920 = vmatmul.mubr.bf16.vlgmr.msra.gmra.mrb[4].mxu1 %v372_v19 }
 0x106   : > { %v1095_v21 = vpop.f32.mrb[0].mxu0 }
 0x107   : > { %v1096_v22 = vpop.f32.mrb[1].mxu0  ;;  %v1117_v23 = vpop.f32.mrb[0].mxu1 }
 0x108   : > { %v1097_v24 = vadd.f32 %v1096_v22, %v1095_v21  ;;  %v1098_v25 = vpop.f32.mrb[2].mxu0  ;;  %v1118_v26 = vpop.f32.mrb[1].mxu1 }
 0x109   : > { %v1099_v27 = vpop.f32.mrb[3].mxu0  ;;  %v1119_v28 = vadd.f32 %v1118_v26, %v1117_v23  ;;  %v1120_v29 = vpop.f32.mrb[2].mxu1 }
 0x10a   : > { %v1121_v30 = vpop.f32.mrb[3].mxu1 }
 0x10b   : > { %v842_v31 = vadd.f32 %v1119_v28, %v1097_v24 }
 0x126   : > { %v1139_v32 = vpop.f32.mrb[4].mxu0 }
 0x127   : > { %v1140_v33 = vpop.f32.mrb[5].mxu0  ;;  %v1161_v34 = vpop.f32.mrb[4].mxu1 }
 0x128   : > { %v1141_v35 = vadd.f32 %v1140_v33, %v1139_v32  ;;  %v1142_v36 = vpop.f32.mrb[6].mxu0  ;;  %v1162_v37 = vpop.f32.mrb[5].mxu1 }
 0x129   : > { %v1143_v38 = vpop.f32.mrb[7].mxu0  ;;  %v1163_v40 = vadd.f32 %v1162_v37, %v1161_v34  ;;  %v1164_v41 = vpop.f32.mrb[6].mxu1 }
 0x12a   : > { %v882_v39 = vadd.f32 %v1141_v35, %v842_v31  ;;  %v1165_v43 = vpop.f32.mrb[7].mxu1 }
 0x12c   : > { %v922_v44 = vadd.f32 %v1163_v40, %v882_v39 }
 0x12e   : > { %v927_v45 = vadd.f32 %v922_v44, %v195_v42 }
 0x130   : > { %928 = vst [vmem:[#allocation2] sm:$0x3] %v927_v45 }
 0x137   : > { %v932_v46 = vld [vmem:[#allocation2] sm:$0x3] }
 0x138   : > { %933 = vst [vmem:[%s188_s25] sm:$0x3] %v932_v46 }
 0x139 PF: > { %s12_s11 = sadd.s32 1, %s1280_s11   ;;  %s1423_s9 = smov %s1276_s10 }
 0x13a   : > { %p9_p7 = scmp.ge.s32.totalorder %s12_s11, 4   ;;  %s1424_s10 = smov %s1426_s12 }
 0x13c   :  { %11 = sbr.rel (!%p9_p7) target bundleno = 2 (0x2), region = 69 }

</bundles_post_ra>
